<compile_context>
chip_gen: v7x
topology: tpu7x:2x2x1
jax: 0.10.0
libtpu: 0.0.40
codegen_flags: <defaults>
</compile_context>

<pallas_src>
import numpy as np
import jax
import jax.numpy as jnp
from jax import lax
from jax.experimental import pallas as pl
from jax.experimental.pallas import tpu as pltpu


# ---------------------------------------------------------------------------
# Fused forward kernel
# ---------------------------------------------------------------------------
def _make_fused_kernel(cfg):
    """Builds the fused forward kernel, specialised on static shape config."""
    n_batch = cfg["n"]
    n_layers = cfg["n_layers"]
    h_last = cfg[f"h{n_layers - 1}"]
    w_last = cfg[f"w{n_layers - 1}"]
    c_last = cfg[f"c{n_layers - 1}"]

    def kernel(*refs):
        # refs = [x, (R, M, shift) * n_layers, w_fc, b_fc, out]
        x_ref = refs[0]
        wfc_ref = refs[1 + 3 * n_layers]
        bfc_ref = refs[2 + 3 * n_layers]
        o_ref = refs[-1]

        # ---- conv + BN + ReLU stack, all on the MXU --------------------------------
        y = x_ref[...]                                    # (N*H, W*Cin), lane-dense
        for li in range(n_layers):
            r_ref = refs[1 + 3 * li]                      # (ks, N*Hout, N*Hin)
            m_ref = refs[2 + 3 * li]                      # (ks, Win*Cin, Wout*Cout)
            s_ref = refs[3 + 3 * li]                      # (1, Wout*Cout)
            ks = r_ref.shape[0]
            acc = jnp.zeros((r_ref.shape[1], m_ref.shape[2]), jnp.float32)
            for dy in range(ks):                          # static unroll (ks == 3)
                t = jnp.dot(y, m_ref[dy], preferred_element_type=jnp.float32)
                acc = acc + jnp.dot(r_ref[dy], t, preferred_element_type=jnp.float32)
            y = jnp.maximum(acc + s_ref[...], 0.0)        # fused BN shift + ReLU

        # ---- AdaptiveConcatPool2d(1): [max, avg] over spatial, per image ------------
        blk_max = y[:, 0:c_last]
        blk_sum = y[:, 0:c_last]
        for jo in range(1, w_last):                       # reduce over output columns
            blk = y[:, jo * c_last:(jo + 1) * c_last]
            blk_max = jnp.maximum(blk_max, blk)
            blk_sum = blk_sum + blk
        inv_hw = 1.0 / float(h_last * w_last)
        rows = []
        for b in range(n_batch):                          # reduce over output rows
            seg_max = blk_max[b * h_last:(b + 1) * h_last, :]
            seg_sum = blk_sum[b * h_last:(b + 1) * h_last, :]
            mx = jnp.max(seg_max, axis=0, keepdims=True)            # (1, C)
            av = jnp.sum(seg_sum, axis=0, keepdims=True) * inv_hw   # (1, C)
            rows.append(jnp.concatenate([mx, av], axis=1))          # (1, 2C): [max, avg]
        pooled = jnp.concatenate(rows, axis=0) if n_batch > 1 else rows[0]

        # ---- linear head (Flatten is implicit in the (N, 2C) layout) ----------------
        o_ref[...] = (
            jnp.dot(pooled, wfc_ref[...], preferred_element_type=jnp.float32)
            + bfc_ref[...]
        )

    return kernel


def make_forward(cfg):
    """Returns a jitted forward(x_nchw, params) specialised on static config."""
    n_layers = cfg["n_layers"]
    arg_names = []
    for li in range(n_layers):
        arg_names += [f"r{li}", f"m{li}", f"s{li}"]
    arg_names += ["wfc", "bfc"]

    kernel = _make_fused_kernel(cfg)
    n_in = 1 + len(arg_names)
    out_shape = jax.ShapeDtypeStruct((cfg["n"], cfg["dout"]), jnp.float32)
    vmem_spec = pl.BlockSpec(memory_space=pltpu.MemorySpace.VMEM)

    @jax.jit
    def forward(x_nchw, params):
        n, c, h, w = x_nchw.shape                 # static python ints at trace time
        # NCHW -> lane-dense (N*H, W*C) slab; boundary layout plumbing done once by XLA.
        x2d = jnp.transpose(x_nchw, (0, 2, 3, 1)).reshape(n * h, w * c)
        x2d = x2d.astype(jnp.float32)
        args = [x2d] + [params[k] for k in arg_names]
        return pl.pallas_call(
            kernel,
            out_shape=out_shape,
            in_specs=[vmem_spec] * n_in,
            out_specs=vmem_spec,
            compiler_params=pltpu.CompilerParams(vmem_limit_bytes=16 * 1024 * 1024),
        )(*args)

    return forward


# ---------------------------------------------------------------------------
# Parameter synthesis + lowering to the fused-kernel parameterisation
# ---------------------------------------------------------------------------
def build_params(key, n, h, w, conv_cfg, fc_cfg):
    """Synthesise deterministic weights and lower them to the fused-kernel form.

    Returns (raw, kern_params, cfg):
      raw         : PyTorch-layout weights (OIHW conv, BN scale/shift, fc) for the
                    plain-JAX reference.
      kern_params : dict of jnp arrays consumed by the fused Pallas kernel.
      cfg         : dict of static python ints baked into the kernel (no tracing).
    """
    eps = 1e-5
    raw_convs = []
    for (ci, co, ks, stride) in conv_cfg:
        key, k_w, k_g, k_b, k_m, k_v = jax.random.split(key, 6)
        w_conv = jax.random.normal(k_w, (co, ci, ks, ks), jnp.float32) * 0.1  # OIHW
        gamma = 1.0 + 0.1 * jax.random.normal(k_g, (co,), jnp.float32)
        beta = 0.1 * jax.random.normal(k_b, (co,), jnp.float32)
        mean = 0.1 * jax.random.normal(k_m, (co,), jnp.float32)
        var = jnp.abs(jax.random.normal(k_v, (co,), jnp.float32)) + 1.0
        scale = gamma / jnp.sqrt(var + eps)          # folded BN (eval mode)
        shift = beta - mean * scale
        raw_convs.append(dict(w=w_conv, scale=scale, shift=shift,
                              ks=ks, stride=stride, cin=ci, cout=co))

    din, dout = fc_cfg
    key, k_fw, k_fb = jax.random.split(key, 3)
    w_fc = jax.random.normal(k_fw, (din, dout), jnp.float32) * 0.1
    b_fc = 0.1 * jax.random.normal(k_fb, (1, dout), jnp.float32)
    raw = dict(convs=raw_convs, wfc=w_fc, bfc=b_fc)

    # Lower each conv layer to (R_dy, M_dy, shift_row):
    #   out[b*Hout+io, jo*Cout+f] =
    #     relu( sum_dy (R_dy @ in @ M_dy)[b*Hout+io, jo*Cout+f] + shift[f] )
    kern_params = {}
    cfg = dict(n=n, n_layers=len(conv_cfg), dout=dout)
    h_in, w_in = h, w
    for li, layer in enumerate(raw_convs):
        ks, stride = layer["ks"], layer["stride"]
        ci, co = layer["cin"], layer["cout"]
        pad = ks // 2
        h_out = (h_in + 2 * pad - ks) // stride + 1
        w_out = (w_in + 2 * pad - ks) // stride + 1
        # Fold BN scale into the conv weight (per output channel).
        w_fold = np.asarray(layer["w"]) * np.asarray(layer["scale"])[:, None, None, None]

        # Column matrices: banded block-Toeplitz over the width/channel axis.
        m_mat = np.zeros((ks, w_in * ci, w_out * co), np.float32)
        for dy in range(ks):
            for jo in range(w_out):
                for dx in range(ks):
                    jin = stride * jo + dx - pad
                    if 0 <= jin < w_in:
                        # block[c, f] = w_fold[f, c, dy, dx]
                        m_mat[dy, jin * ci:(jin + 1) * ci, jo * co:(jo + 1) * co] = \
                            w_fold[:, :, dy, dx].T

        # Row-selection matrices: vertical shift + stride + zero padding per batch image.
        r_mat = np.zeros((ks, n * h_out, n * h_in), np.float32)
        for dy in range(ks):
            for b in range(n):
                for io in range(h_out):
                    ii = stride * io + dy - pad
                    if 0 <= ii < h_in:
                        r_mat[dy, b * h_out + io, b * h_in + ii] = 1.0

        s_row = np.tile(np.asarray(layer["shift"]), w_out).reshape(1, w_out * co)

        kern_params[f"r{li}"] = jnp.asarray(r_mat)
        kern_params[f"m{li}"] = jnp.asarray(m_mat)
        kern_params[f"s{li}"] = jnp.asarray(s_row.astype(np.float32))
        cfg[f"h{li}"], cfg[f"w{li}"], cfg[f"c{li}"] = h_out, w_out, co
        h_in, w_in = h_out, w_out

    kern_params["wfc"] = w_fc
    kern_params["bfc"] = b_fc
    return raw, kern_params, cfg


# ---------------------------------------------------------------------------
# Plain-JAX reference (not a Pallas kernel) for a correctness self-check
# ---------------------------------------------------------------------------
def reference_forward(x_nchw, raw):
    y = x_nchw.astype(jnp.float32)
    for layer in raw["convs"]:
        s, p = layer["stride"], layer["ks"] // 2
        y = lax.conv_general_dilated(
            y, layer["w"], window_strides=(s, s), padding=((p, p), (p, p)),
            dimension_numbers=("NCHW", "OIHW", "NCHW"))
        y = y * layer["scale"][None, :, None, None] + layer["shift"][None, :, None, None]
        y = jnp.maximum(y, 0.0)
    mx = jnp.max(y, axis=(2, 3))
    av = jnp.mean(y, axis=(2, 3))
    pooled = jnp.concatenate([mx, av], axis=1)     # AdaptiveConcatPool2d: [max, avg]
    return pooled @ raw["wfc"] + raw["bfc"]


# ---------------------------------------------------------------------------
if __name__ == "__main__":
    # FaceGridModel(params) with params = [conv0, conv1, linear]:
    #   conv_layer(4, 8, ks=3, stride=1), conv_layer(8, 16, ks=3, stride=2),
    #   linear_layer(2*16, 10)   (AdaptiveConcatPool2d doubles the channels)
    N, CIN, H, W = 2, 4, 16, 16
    conv_cfg = [(4, 8, 3, 1), (8, 16, 3, 2)]
    fc_cfg = (2 * conv_cfg[-1][1], 10)

    key = jax.random.PRNGKey(0)
    key, k_x = jax.random.split(key)
    x = jax.random.normal(k_x, (N, CIN, H, W), jnp.float32)   # NCHW like PyTorch

    raw, kern_params, cfg = build_params(key, N, H, W, conv_cfg, fc_cfg)
    forward = make_forward(cfg)

    out = jax.block_until_ready(forward(x, kern_params))
    assert out.shape == (N, fc_cfg[1]), out.shape

    # Self-check against the plain-JAX reference.  Loose tolerance: MXU f32 dots
    # may use bf16 passes under default precision on real TPUs.
    ref = jax.block_until_ready(reference_forward(x, raw))
    np.testing.assert_allclose(np.asarray(out), np.asarray(ref), rtol=3e-2, atol=3e-2)

    print("KERNEL_OK")
</pallas_src>

<mosaic_0001>
module attributes {stable_mosaic.version = 11 : i64} {
  func.func @kernel(%arg0: memref<32x64xf32, #tpu.memory_space<vmem>>, %arg1: memref<3x32x32xf32, #tpu.memory_space<vmem>>, %arg2: memref<3x64x128xf32, #tpu.memory_space<vmem>>, %arg3: memref<1x128xf32, #tpu.memory_space<vmem>>, %arg4: memref<3x16x32xf32, #tpu.memory_space<vmem>>, %arg5: memref<3x128x128xf32, #tpu.memory_space<vmem>>, %arg6: memref<1x128xf32, #tpu.memory_space<vmem>>, %arg7: memref<32x10xf32, #tpu.memory_space<vmem>>, %arg8: memref<1x10xf32, #tpu.memory_space<vmem>>, %arg9: memref<2x10xf32, #tpu.memory_space<vmem>>) attributes {dimension_semantics = [], scalar_prefetch = 0 : i64, scratch_operands = 0 : i64, tpu.core_type = #tpu.core_type<tc>} {
    %c0 = arith.constant 0 : index
    %c0_0 = arith.constant 0 : index
    %0 = vector.load %arg0[%c0, %c0_0] : memref<32x64xf32, #tpu.memory_space<vmem>>, vector<32x64xf32>
    %cst = arith.constant 0.000000e+00 : f32
    %1 = vector.broadcast %cst : f32 to vector<32x128xf32>
    %c0_1 = arith.constant 0 : index
    %c0_2 = arith.constant 0 : index
    %c0_3 = arith.constant 0 : index
    %2 = vector.load %arg2[%c0_1, %c0_2, %c0_3] : memref<3x64x128xf32, #tpu.memory_space<vmem>>, vector<1x64x128xf32>
    %3 = vector.shape_cast %2 : vector<1x64x128xf32> to vector<64x128xf32>
    %cst_4 = arith.constant dense<0.000000e+00> : vector<32x128xf32>
    %4 = tpu.matmul %0, %3, %cst_4 {dimension_numbers = #tpu.dot_dimension_numbers<[1], [0], [0], [1], [0, 0, 1, 1], [], []>} : vector<32x64xf32>, vector<64x128xf32>, vector<32x128xf32> -> vector<32x128xf32>
    %c0_5 = arith.constant 0 : index
    %c0_6 = arith.constant 0 : index
    %c0_7 = arith.constant 0 : index
    %5 = vector.load %arg1[%c0_5, %c0_6, %c0_7] : memref<3x32x32xf32, #tpu.memory_space<vmem>>, vector<1x32x32xf32>
    %6 = vector.shape_cast %5 : vector<1x32x32xf32> to vector<32x32xf32>
    %cst_8 = arith.constant dense<0.000000e+00> : vector<32x128xf32>
    %7 = tpu.matmul %6, %4, %cst_8 {dimension_numbers = #tpu.dot_dimension_numbers<[1], [0], [0], [1], [0, 0, 1, 1], [], []>} : vector<32x32xf32>, vector<32x128xf32>, vector<32x128xf32> -> vector<32x128xf32>
    %8 = arith.addf %1, %7 : vector<32x128xf32>
    %c1 = arith.constant 1 : index
    %c0_9 = arith.constant 0 : index
    %c0_10 = arith.constant 0 : index
    %9 = vector.load %arg2[%c1, %c0_9, %c0_10] : memref<3x64x128xf32, #tpu.memory_space<vmem>>, vector<1x64x128xf32>
    %10 = vector.shape_cast %9 : vector<1x64x128xf32> to vector<64x128xf32>
    %cst_11 = arith.constant dense<0.000000e+00> : vector<32x128xf32>
    %11 = tpu.matmul %0, %10, %cst_11 {dimension_numbers = #tpu.dot_dimension_numbers<[1], [0], [0], [1], [0, 0, 1, 1], [], []>} : vector<32x64xf32>, vector<64x128xf32>, vector<32x128xf32> -> vector<32x128xf32>
    %c1_12 = arith.constant 1 : index
    %c0_13 = arith.constant 0 : index
    %c0_14 = arith.constant 0 : index
    %12 = vector.load %arg1[%c1_12, %c0_13, %c0_14] : memref<3x32x32xf32, #tpu.memory_space<vmem>>, vector<1x32x32xf32>
    %13 = vector.shape_cast %12 : vector<1x32x32xf32> to vector<32x32xf32>
    %cst_15 = arith.constant dense<0.000000e+00> : vector<32x128xf32>
    %14 = tpu.matmul %13, %11, %cst_15 {dimension_numbers = #tpu.dot_dimension_numbers<[1], [0], [0], [1], [0, 0, 1, 1], [], []>} : vector<32x32xf32>, vector<32x128xf32>, vector<32x128xf32> -> vector<32x128xf32>
    %15 = arith.addf %8, %14 : vector<32x128xf32>
    %c2 = arith.constant 2 : index
    %c0_16 = arith.constant 0 : index
    %c0_17 = arith.constant 0 : index
    %16 = vector.load %arg2[%c2, %c0_16, %c0_17] : memref<3x64x128xf32, #tpu.memory_space<vmem>>, vector<1x64x128xf32>
    %17 = vector.shape_cast %16 : vector<1x64x128xf32> to vector<64x128xf32>
    %cst_18 = arith.constant dense<0.000000e+00> : vector<32x128xf32>
    %18 = tpu.matmul %0, %17, %cst_18 {dimension_numbers = #tpu.dot_dimension_numbers<[1], [0], [0], [1], [0, 0, 1, 1], [], []>} : vector<32x64xf32>, vector<64x128xf32>, vector<32x128xf32> -> vector<32x128xf32>
    %c2_19 = arith.constant 2 : index
    %c0_20 = arith.constant 0 : index
    %c0_21 = arith.constant 0 : index
    %19 = vector.load %arg1[%c2_19, %c0_20, %c0_21] : memref<3x32x32xf32, #tpu.memory_space<vmem>>, vector<1x32x32xf32>
    %20 = vector.shape_cast %19 : vector<1x32x32xf32> to vector<32x32xf32>
    %cst_22 = arith.constant dense<0.000000e+00> : vector<32x128xf32>
    %21 = tpu.matmul %20, %18, %cst_22 {dimension_numbers = #tpu.dot_dimension_numbers<[1], [0], [0], [1], [0, 0, 1, 1], [], []>} : vector<32x32xf32>, vector<32x128xf32>, vector<32x128xf32> -> vector<32x128xf32>
    %22 = arith.addf %15, %21 : vector<32x128xf32>
    %c0_23 = arith.constant 0 : index
    %c0_24 = arith.constant 0 : index
    %23 = vector.load %arg3[%c0_23, %c0_24] : memref<1x128xf32, #tpu.memory_space<vmem>>, vector<1x128xf32>
    %24 = vector.broadcast %23 : vector<1x128xf32> to vector<32x128xf32>
    %25 = arith.addf %22, %24 : vector<32x128xf32>
    %cst_25 = arith.constant 0.000000e+00 : f32
    %26 = vector.broadcast %cst_25 : f32 to vector<32x128xf32>
    %27 = arith.maximumf %25, %26 : vector<32x128xf32>
    %cst_26 = arith.constant 0.000000e+00 : f32
    %28 = vector.broadcast %cst_26 : f32 to vector<16x128xf32>
    %c0_27 = arith.constant 0 : index
    %c0_28 = arith.constant 0 : index
    %c0_29 = arith.constant 0 : index
    %29 = vector.load %arg5[%c0_27, %c0_28, %c0_29] : memref<3x128x128xf32, #tpu.memory_space<vmem>>, vector<1x128x128xf32>
    %30 = vector.shape_cast %29 : vector<1x128x128xf32> to vector<128x128xf32>
    %cst_30 = arith.constant dense<0.000000e+00> : vector<32x128xf32>
    %31 = tpu.matmul %27, %30, %cst_30 {dimension_numbers = #tpu.dot_dimension_numbers<[1], [0], [0], [1], [0, 0, 1, 1], [], []>} : vector<32x128xf32>, vector<128x128xf32>, vector<32x128xf32> -> vector<32x128xf32>
    %c0_31 = arith.constant 0 : index
    %c0_32 = arith.constant 0 : index
    %c0_33 = arith.constant 0 : index
    %32 = vector.load %arg4[%c0_31, %c0_32, %c0_33] : memref<3x16x32xf32, #tpu.memory_space<vmem>>, vector<1x16x32xf32>
    %33 = vector.shape_cast %32 : vector<1x16x32xf32> to vector<16x32xf32>
    %cst_34 = arith.constant dense<0.000000e+00> : vector<16x128xf32>
    %34 = tpu.matmul %33, %31, %cst_34 {dimension_numbers = #tpu.dot_dimension_numbers<[1], [0], [0], [1], [0, 0, 1, 1], [], []>} : vector<16x32xf32>, vector<32x128xf32>, vector<16x128xf32> -> vector<16x128xf32>
    %35 = arith.addf %28, %34 : vector<16x128xf32>
    %c1_35 = arith.constant 1 : index
    %c0_36 = arith.constant 0 : index
    %c0_37 = arith.constant 0 : index
    %36 = vector.load %arg5[%c1_35, %c0_36, %c0_37] : memref<3x128x128xf32, #tpu.memory_space<vmem>>, vector<1x128x128xf32>
    %37 = vector.shape_cast %36 : vector<1x128x128xf32> to vector<128x128xf32>
    %cst_38 = arith.constant dense<0.000000e+00> : vector<32x128xf32>
    %38 = tpu.matmul %27, %37, %cst_38 {dimension_numbers = #tpu.dot_dimension_numbers<[1], [0], [0], [1], [0, 0, 1, 1], [], []>} : vector<32x128xf32>, vector<128x128xf32>, vector<32x128xf32> -> vector<32x128xf32>
    %c1_39 = arith.constant 1 : index
    %c0_40 = arith.constant 0 : index
    %c0_41 = arith.constant 0 : index
    %39 = vector.load %arg4[%c1_39, %c0_40, %c0_41] : memref<3x16x32xf32, #tpu.memory_space<vmem>>, vector<1x16x32xf32>
    %40 = vector.shape_cast %39 : vector<1x16x32xf32> to vector<16x32xf32>
    %cst_42 = arith.constant dense<0.000000e+00> : vector<16x128xf32>
    %41 = tpu.matmul %40, %38, %cst_42 {dimension_numbers = #tpu.dot_dimension_numbers<[1], [0], [0], [1], [0, 0, 1, 1], [], []>} : vector<16x32xf32>, vector<32x128xf32>, vector<16x128xf32> -> vector<16x128xf32>
    %42 = arith.addf %35, %41 : vector<16x128xf32>
    %c2_43 = arith.constant 2 : index
    %c0_44 = arith.constant 0 : index
    %c0_45 = arith.constant 0 : index
    %43 = vector.load %arg5[%c2_43, %c0_44, %c0_45] : memref<3x128x128xf32, #tpu.memory_space<vmem>>, vector<1x128x128xf32>
    %44 = vector.shape_cast %43 : vector<1x128x128xf32> to vector<128x128xf32>
    %cst_46 = arith.constant dense<0.000000e+00> : vector<32x128xf32>
    %45 = tpu.matmul %27, %44, %cst_46 {dimension_numbers = #tpu.dot_dimension_numbers<[1], [0], [0], [1], [0, 0, 1, 1], [], []>} : vector<32x128xf32>, vector<128x128xf32>, vector<32x128xf32> -> vector<32x128xf32>
    %c2_47 = arith.constant 2 : index
    %c0_48 = arith.constant 0 : index
    %c0_49 = arith.constant 0 : index
    %46 = vector.load %arg4[%c2_47, %c0_48, %c0_49] : memref<3x16x32xf32, #tpu.memory_space<vmem>>, vector<1x16x32xf32>
    %47 = vector.shape_cast %46 : vector<1x16x32xf32> to vector<16x32xf32>
    %cst_50 = arith.constant dense<0.000000e+00> : vector<16x128xf32>
    %48 = tpu.matmul %47, %45, %cst_50 {dimension_numbers = #tpu.dot_dimension_numbers<[1], [0], [0], [1], [0, 0, 1, 1], [], []>} : vector<16x32xf32>, vector<32x128xf32>, vector<16x128xf32> -> vector<16x128xf32>
    %49 = arith.addf %42, %48 : vector<16x128xf32>
    %c0_51 = arith.constant 0 : index
    %c0_52 = arith.constant 0 : index
    %50 = vector.load %arg6[%c0_51, %c0_52] : memref<1x128xf32, #tpu.memory_space<vmem>>, vector<1x128xf32>
    %51 = vector.broadcast %50 : vector<1x128xf32> to vector<16x128xf32>
    %52 = arith.addf %49, %51 : vector<16x128xf32>
    %cst_53 = arith.constant 0.000000e+00 : f32
    %53 = vector.broadcast %cst_53 : f32 to vector<16x128xf32>
    %54 = arith.maximumf %52, %53 : vector<16x128xf32>
    %55 = vector.extract_strided_slice %54 {offsets = [0, 0], sizes = [16, 16], strides = [1, 1]} : vector<16x128xf32> to vector<16x16xf32>
    %56 = vector.extract_strided_slice %54 {offsets = [0, 0], sizes = [16, 16], strides = [1, 1]} : vector<16x128xf32> to vector<16x16xf32>
    %57 = vector.extract_strided_slice %54 {offsets = [0, 16], sizes = [16, 16], strides = [1, 1]} : vector<16x128xf32> to vector<16x16xf32>
    %58 = arith.maximumf %55, %57 : vector<16x16xf32>
    %59 = arith.addf %56, %57 : vector<16x16xf32>
    %60 = vector.extract_strided_slice %54 {offsets = [0, 32], sizes = [16, 16], strides = [1, 1]} : vector<16x128xf32> to vector<16x16xf32>
    %61 = arith.maximumf %58, %60 : vector<16x16xf32>
    %62 = arith.addf %59, %60 : vector<16x16xf32>
    %63 = vector.extract_strided_slice %54 {offsets = [0, 48], sizes = [16, 16], strides = [1, 1]} : vector<16x128xf32> to vector<16x16xf32>
    %64 = arith.maximumf %61, %63 : vector<16x16xf32>
    %65 = arith.addf %62, %63 : vector<16x16xf32>
    %66 = vector.extract_strided_slice %54 {offsets = [0, 64], sizes = [16, 16], strides = [1, 1]} : vector<16x128xf32> to vector<16x16xf32>
    %67 = arith.maximumf %64, %66 : vector<16x16xf32>
    %68 = arith.addf %65, %66 : vector<16x16xf32>
    %69 = vector.extract_strided_slice %54 {offsets = [0, 80], sizes = [16, 16], strides = [1, 1]} : vector<16x128xf32> to vector<16x16xf32>
    %70 = arith.maximumf %67, %69 : vector<16x16xf32>
    %71 = arith.addf %68, %69 : vector<16x16xf32>
    %72 = vector.extract_strided_slice %54 {offsets = [0, 96], sizes = [16, 16], strides = [1, 1]} : vector<16x128xf32> to vector<16x16xf32>
    %73 = arith.maximumf %70, %72 : vector<16x16xf32>
    %74 = arith.addf %71, %72 : vector<16x16xf32>
    %75 = vector.extract_strided_slice %54 {offsets = [0, 112], sizes = [16, 16], strides = [1, 1]} : vector<16x128xf32> to vector<16x16xf32>
    %76 = arith.maximumf %73, %75 : vector<16x16xf32>
    %77 = arith.addf %74, %75 : vector<16x16xf32>
    %78 = vector.extract_strided_slice %76 {offsets = [0, 0], sizes = [8, 16], strides = [1, 1]} : vector<16x16xf32> to vector<8x16xf32>
    %79 = vector.extract_strided_slice %77 {offsets = [0, 0], sizes = [8, 16], strides = [1, 1]} : vector<16x16xf32> to vector<8x16xf32>
    %cst_54 = arith.constant dense<0xFF800000> : vector<16xf32>
    %80 = vector.multi_reduction <maximumf>, %78, %cst_54 [0] : vector<8x16xf32> to vector<16xf32>
    %81 = vector.shape_cast %80 : vector<16xf32> to vector<1x16xf32>
    %cst_55 = arith.constant dense<0.000000e+00> : vector<16xf32>
    %82 = vector.multi_reduction <add>, %79, %cst_55 [0] : vector<8x16xf32> to vector<16xf32>
    %83 = vector.shape_cast %82 : vector<16xf32> to vector<1x16xf32>
    %cst_56 = arith.constant 1.562500e-02 : f32
    %84 = vector.broadcast %cst_56 : f32 to vector<1x16xf32>
    %85 = arith.mulf %83, %84 : vector<1x16xf32>
    %86 = tpu.concatenate %81, %85 in 1 : vector<1x16xf32>, vector<1x16xf32> -> vector<1x32xf32>
    %87 = vector.extract_strided_slice %76 {offsets = [8, 0], sizes = [8, 16], strides = [1, 1]} : vector<16x16xf32> to vector<8x16xf32>
    %88 = vector.extract_strided_slice %77 {offsets = [8, 0], sizes = [8, 16], strides = [1, 1]} : vector<16x16xf32> to vector<8x16xf32>
    %cst_57 = arith.constant dense<0xFF800000> : vector<16xf32>
    %89 = vector.multi_reduction <maximumf>, %87, %cst_57 [0] : vector<8x16xf32> to vector<16xf32>
    %90 = vector.shape_cast %89 : vector<16xf32> to vector<1x16xf32>
    %cst_58 = arith.constant dense<0.000000e+00> : vector<16xf32>
    %91 = vector.multi_reduction <add>, %88, %cst_58 [0] : vector<8x16xf32> to vector<16xf32>
    %92 = vector.shape_cast %91 : vector<16xf32> to vector<1x16xf32>
    %cst_59 = arith.constant 1.562500e-02 : f32
    %93 = vector.broadcast %cst_59 : f32 to vector<1x16xf32>
    %94 = arith.mulf %92, %93 : vector<1x16xf32>
    %95 = tpu.concatenate %90, %94 in 1 : vector<1x16xf32>, vector<1x16xf32> -> vector<1x32xf32>
    %96 = tpu.concatenate %86, %95 in 0 : vector<1x32xf32>, vector<1x32xf32> -> vector<2x32xf32>
    %c0_60 = arith.constant 0 : index
    %c0_61 = arith.constant 0 : index
    %97 = vector.load %arg7[%c0_60, %c0_61] : memref<32x10xf32, #tpu.memory_space<vmem>>, vector<32x10xf32>
    %cst_62 = arith.constant dense<0.000000e+00> : vector<2x10xf32>
    %98 = tpu.matmul %96, %97, %cst_62 {dimension_numbers = #tpu.dot_dimension_numbers<[1], [0], [0], [1], [0, 0, 1, 1], [], []>} : vector<2x32xf32>, vector<32x10xf32>, vector<2x10xf32> -> vector<2x10xf32>
    %c0_63 = arith.constant 0 : index
    %c0_64 = arith.constant 0 : index
    %99 = vector.load %arg8[%c0_63, %c0_64] : memref<1x10xf32, #tpu.memory_space<vmem>>, vector<1x10xf32>
    %100 = vector.broadcast %99 : vector<1x10xf32> to vector<2x10xf32>
    %101 = arith.addf %98, %100 : vector<2x10xf32>
    %c0_65 = arith.constant 0 : index
    %c0_66 = arith.constant 0 : index
    %102 = vector.load %arg9[%c0_65, %c0_66] : memref<2x10xf32, #tpu.memory_space<vmem>>, vector<2x10xf32>
    tpu.vector_store %arg9[%c0_65, %c0_66], %101 {strides = array<i32>} : memref<2x10xf32, #tpu.memory_space<vmem>>, vector<2x10xf32>,
    return
  }
}

</mosaic_0001>

<bundles_post_ra>
// kernel: forward.1
= control target key start
LH: loop header
LB: loop body
LE: loop exit
PB: predicated region body
PF: predicated region fallthrough
CT: control target
= control target key end

     0   :  { %14 = vsyncpa [#allocation3], 0  ;;  %s2684_s0 = inlined_call_operand.vmem [shape: f32[32,64], index: 0, kind: input, shape index: {}]   ;;  %s2685_s1 = inlined_call_operand.hbm [shape: f32[3,32,32], index: 1, kind: input, shape index: {}]   ;;  %s2686_s2 = inlined_call_operand.vmem [shape: f32[3,64,128], index: 2, kind: input, shape index: {}]   ;;  %s2687_s3 = inlined_call_operand.vmem [shape: f32[1,128], index: 3, kind: input, shape index: {}]   ;;  %s2688_s4 = inlined_call_operand.hbm [shape: f32[3,16,32], index: 4, kind: input, shape index: {}]   ;;  %s2689_s5 = inlined_call_operand.vmem [shape: f32[3,128,128], index: 5, kind: input, shape index: {}]   ;;  %s2690_s6 = inlined_call_operand.vmem [shape: f32[1,128], index: 6, kind: input, shape index: {}]   ;;  %s2691_s7 = inlined_call_operand.vmem [shape: f32[32,10], index: 7, kind: input, shape index: {}]   ;;  %s2692_s8 = inlined_call_operand.vmem [shape: f32[1,10], index: 8, kind: input, shape index: {}]   ;;  %s2693_s9 = inlined_call_operand.hbm [shape: f32[2,10], index: 9, kind: output, shape index: {}]  }
   0x1   :  { %15 = vsyncpa [#allocation6], 0 }
   0x2   :  { %16 = vsyncpa [#allocation4], 0  ;;  %s2261_s30 = smov [#allocation2]   ;;  %s2189_s13 = scalar_lea.hbm %s2685_s1, 1536 }
   0x3   :  { %s24_s10 = sshll.u32 %s2261_s30, 4  ;;  %p2190_p0 = scmp.ne.s32.totalorder %s2685_s1, %s2189_s13  ;;  %s25_s10 = int_to_ptr.vmem [resolvable:$true] %s24_s10 }
   0x4   :  { %p2193_p1 = scmp.lt.u32.totalorder %s2189_s13, %s2685_s1 }
   0x6   :  { %p2195_p2 = pnand %p2193_p1, %p2190_p0 }
   0x8   :  { %2198 = shalt.err (!%p2195_p2)
}
   0x9   :  { %s2199_s18 = scalar_lea.vmem %s25_s10, 1536  ;;  %p2204_p4 = scmp.lt.s32.totalorder %s25_s10, %s25_s10 }
   0xa   :  { %p2200_p3 = scmp.ne.s32.totalorder %s25_s10, %s2199_s18  ;;  %p2205_p5 = scmp.lt.s32.totalorder %s2199_s18, %s2199_s18 }
   0xc   :  { %p2206_p6 = por %p2205_p5, %p2204_p4 }
   0xe   :  { %p2207_p7 = pnand %p2206_p6, %p2200_p3 }
  0x10   :  { %2210 = shalt.err (!%p2207_p7)
}
  0x11   :  { %s2262_s19 = smov 128   ;;  %s2263_s20 = smov 8  }
  0x12   :  { %30 = dma.hbm_to_vmem [thread:$0]  %s2685_s1, 1536, %s25_s10, [#allocation3], %s2262_s19, %s2262_s19, %s2263_s20  }
  0x13   :  { %s2264_s23 = smov [#allocation5]   ;;  %s2211_s27 = scalar_lea.hbm %s2688_s4, 768 }
  0x14   :  { %s40_s24 = sshll.u32 %s2264_s23, 4  ;;  %p2212_p8 = scmp.ne.s32.totalorder %s2688_s4, %s2211_s27  ;;  %s41_s24 = int_to_ptr.vmem [resolvable:$true] %s40_s24 }
  0x15   :  { %p2215_p9 = scmp.lt.u32.totalorder %s2211_s27, %s2688_s4 }
  0x17   :  { %p2217_p10 = pnand %p2215_p9, %p2212_p8 }
  0x19   :  { %2220 = shalt.err (!%p2217_p10)
}
  0x1a   :  { %s2221_s12 = scalar_lea.vmem %s41_s24, 768  ;;  %p2226_p12 = scmp.lt.s32.totalorder %s41_s24, %s41_s24 }
  0x1b   :  { %p2222_p11 = scmp.ne.s32.totalorder %s41_s24, %s2221_s12  ;;  %p2227_p13 = scmp.lt.s32.totalorder %s2221_s12, %s2221_s12 }
  0x1d   :  { %p2228_p0 = por %p2227_p13, %p2226_p12 }
  0x1f   :  { %p2229_p1 = pnand %p2228_p0, %p2222_p11 }
  0x21   :  { %2232 = shalt.err (!%p2229_p1)
}
  0x22   :  { %46 = dma.hbm_to_vmem [thread:$0]  %s2688_s4, 768, %s41_s24, [#allocation6], %s2262_s19, %s2262_s19, %s2263_s20  }
  0x23   :  { %2255 = dma.done.wait [#allocation3], 1536  }
  0x24   :  { %2256 = vsyncadd [#allocation3], 4294965760 }
  0x25   :  { %2257 = dma.done.wait [#allocation6], 768  }
  0x26   :  { %2258 = vsyncadd [#allocation6], 4294966528  ;;  %v1477_v0 = vld [vmem:[%s2686_s2 + $0x40] sm:$0xff]  ;;  %v1478_v1 = vld [vmem:[%s2686_s2 + $0x48] sm:$0xff]  ;;  %vm73_vm0 = vcmask 523264   ;;  %vm274_vm1 = vcmask 261120  }
  0x27   :  { %v1479_v2 = vld [vmem:[%s2686_s2 + $0x50] sm:$0xff]  ;;  %v1980_v3 = vpack.c.bf16 %v1478_v1, %v1477_v0  ;;  %v1480_v4 = vld [vmem:[%s2686_s2 + $0x58] sm:$0xff]  ;;  %v1481_v6 = vld [vmem:[%s2686_s2 + $0x60] sm:$0xff]  ;;  %s2267_s4 = smov 80   ;;  %s2269_s19 = smov 48   ;;  %vm1325_vm2 = vcmask 130048  }
  0x28   :  { %v1984_v5 = vpack.c.bf16 %v1480_v4, %v1479_v2  ;;  %v1482_v7 = vld [vmem:[%s2686_s2 + $0x68] sm:$0xff]  ;;  %v2371_v8 = vld [vmem:[%s2684_s0] sm:$0xff]  ;;  %v1483_v10 = vld [vmem:[%s2686_s2 + $0x70] sm:$0xff]  ;;  %s2271_s20 = smov 16   ;;  %vm2273_vm3 = vmmov 0   ;;  %vm1369_vm4 = vcmask 1040384  }
  0x29   :  { %1981 = vmatprep.subr.bf16.mxu1 %v1980_v3  ;;  %1736 = vmatprep.mubr.msk.f32.mxu1 %vm73_vm0, %v2371_v8  ;;  %v1988_v9 = vpack.c.bf16 %v1482_v7, %v1481_v6  ;;  %v1484_v11 = vld [vmem:[%s2686_s2 + $0x78] sm:$0xff]  ;;  %v2386_v13 = vld [vmem:[%s2684_s0 + $0x8] sm:$0xff]  ;;  %v2391_v14 = vld [vmem:[%s2684_s0 + $0x10] sm:$0xff]  ;;  %s2275_s11 = smov [#allocation7]   ;;  %vm1455_vm5 = vcmask 74752  }
  0x2a   :  { %1983 = vmatpush3.bf16.msra.mxu1 %v1980_v3  ;;  %1714 = vmatprep.mubr.msk.f32.mxu0 %vm73_vm0, %v2371_v8  ;;  %v1992_v12 = vpack.c.bf16 %v1484_v11, %v1483_v10  ;;  %v2400_v15 = vld [vmem:[%s2684_s0 + $0x18] sm:$0xff]  ;;  %v65_v16 = vld [vmem:[%s2686_s2] sm:$0xff]  ;;  %v66_v17 = vld [vmem:[%s2686_s2 + $0x8] sm:$0xff]  ;;  %s2265_s0 = smov 96   ;;  %s1463_s12 = sshll.u32 %s2275_s11, 4  ;;  %s1464_s12 = int_to_ptr.vmem [resolvable:$true] %s1463_s12 }
  0x2b   :  { %1985 = vmatprep.subr.bf16.mxu1 %v1984_v5  ;;  %v1964_v18 = vpack.c.bf16 %v66_v17, %v65_v16  ;;  %v67_v19 = vld [vmem:[%s2686_s2 + $0x10] sm:$0xff]  ;;  %v68_v20 = vld [vmem:[%s2686_s2 + $0x18] sm:$0xff]  ;;  %v69_v22 = vld [vmem:[%s2686_s2 + $0x20] sm:$0xff]  ;;  %s2233_s1 = scalar_lea.vmem %s1464_s12, 32  ;;  %p2238_p3 = scmp.lt.s32.totalorder %s1464_s12, %s1464_s12 }
  0x2c   :  { %v1968_v21 = vpack.c.bf16 %v68_v20, %v67_v19  ;;  %v70_v23 = vld [vmem:[%s2686_s2 + $0x28] sm:$0xff]  ;;  %v270_v25 = vld [vmem:[#allocation2 + $0x20] sm:$0xff]  ;;  %v71_v26 = vld [vmem:[%s2686_s2 + $0x30] sm:$0xff]  ;;  %p2234_p2 = scmp.ne.s32.totalorder %s1464_s12, %s2233_s1  ;;  %p2239_p4 = scmp.lt.s32.totalorder %s2233_s1, %s2233_s1 }
  0x2d   :  { %1965 = vmatprep.subr.bf16.mxu0 %v1964_v18  ;;  %v1972_v24 = vpack.c.bf16 %v70_v23, %v69_v22  ;;  %v72_v27 = vld [vmem:[%s2686_s2 + $0x38] sm:$0xff]  ;;  %v1497_v32 = vld [vmem:[%s2686_s2 + $0x80] sm:$0xff]  ;;  %v1498_v33 = vld [vmem:[%s2686_s2 + $0x88] sm:$0xff] }
  0x2e   :  { %1987 = vmatpush3.bf16.msra.mxu1 %v1984_v5  ;;  %1967 = vmatpush3.bf16.msra.mxu0 %v1964_v18  ;;  %v1976_v28 = vpack.c.bf16 %v72_v27, %v71_v26  ;;  %v2012_v37 = vpack.c.bf16 %v1498_v33, %v1497_v32  ;;  %v1499_v38 = vld [vmem:[%s2686_s2 + $0x90] sm:$0xff]  ;;  %v1500_v39 = vld [vmem:[%s2686_s2 + $0x98] sm:$0xff]  ;;  %v271_v40 = vld [vmem:[#allocation2 + $0x28] sm:$0xff]  ;;  %p2240_p5 = por %p2239_p4, %p2238_p3 }
  0x2f   :  { %1989 = vmatprep.subr.bf16.mxu1 %v1988_v9  ;;  %1969 = vmatprep.subr.bf16.mxu0 %v1968_v21  ;;  %v2016_v41 = vpack.c.bf16 %v1500_v39, %v1499_v38  ;;  %v272_v42 = vld [vmem:[#allocation2 + $0x30] sm:$0xff]  ;;  %v1501_v43 = vld [vmem:[%s2686_s2 + $0xa0] sm:$0xff]  ;;  %v1502_v44 = vld [vmem:[%s2686_s2 + $0xa8] sm:$0xff] }
  0x30   :  { %v273_v45 = vld [vmem:[#allocation2 + $0x38] sm:$0xff]  ;;  %v2020_v46 = vpack.c.bf16 %v1502_v44, %v1501_v43  ;;  %v1503_v47 = vld [vmem:[%s2686_s2 + $0xb0] sm:$0xff]  ;;  %v171_v56 = vld [vmem:[#allocation2] sm:$0xff]  ;;  %p2241_p6 = pnand %p2240_p5, %p2234_p2 }
  0x31   :  { %v1504_v48 = vld [vmem:[%s2686_s2 + $0xb8] sm:$0xff]  ;;  %v172_v57 = vld [vmem:[#allocation2 + $0x8] sm:$0xff]  ;;  %v173_v58 = vld [vmem:[#allocation2 + $0x10] sm:$0xff]  ;;  %s2268_s2 = smov 64  }
  0x32   :  { %1991 = vmatpush3.bf16.msra.mxu1 %v1988_v9  ;;  %1971 = vmatpush3.bf16.msra.mxu0 %v1968_v21  ;;  %v2024_v49 = vpack.c.bf16 %v1504_v48, %v1503_v47  ;;  %v174_v59 = vld [vmem:[#allocation2 + $0x18] sm:$0xff]  ;;  %v564_v60 = vld [vmem:[#allocation2 + $0x40] sm:$0xff]  ;;  %v685_v62 = vld [vmem:[%s2689_s5 + $0x8] sm:$0xff] }
  0x33   :  { %1993 = vmatprep.subr.bf16.mxu1 %v1992_v12  ;;  %1973 = vmatprep.subr.bf16.mxu0 %v1972_v24  ;;  %v684_v61 = vld [vmem:[%s2689_s5] sm:$0xff]  ;;  %v686_v0 = vld [vmem:[%s2689_s5 + $0x10] sm:$0xff]  ;;  %v687_v1 = vld [vmem:[%s2689_s5 + $0x18] sm:$0xff] }
  0x34   :  { %v2036_v63 = vpack.c.bf16 %v685_v62, %v684_v61  ;;  %v2040_v2 = vpack.c.bf16 %v687_v1, %v686_v0  ;;  %v688_v3 = vld [vmem:[%s2689_s5 + $0x20] sm:$0xff]  ;;  %v689_v4 = vld [vmem:[%s2689_s5 + $0x28] sm:$0xff]  ;;  %v690_v6 = vld [vmem:[%s2689_s5 + $0x30] sm:$0xff] }
  0x35   :  { %v2044_v5 = vpack.c.bf16 %v689_v4, %v688_v3  ;;  %v691_v7 = vld [vmem:[%s2689_s5 + $0x38] sm:$0xff]  ;;  %v692_v9 = vld [vmem:[%s2689_s5 + $0x40] sm:$0xff]  ;;  %v693_v10 = vld [vmem:[%s2689_s5 + $0x48] sm:$0xff] }
  0x36   :  { %1995 = vmatpush3.bf16.msra.mxu1 %v1992_v12  ;;  %1975 = vmatpush3.bf16.msra.mxu0 %v1972_v24  ;;  %v2052_v11 = vpack.c.bf16 %v693_v10, %v692_v9  ;;  %v694_v12 = vld [vmem:[%s2689_s5 + $0x50] sm:$0xff]  ;;  %v1514_v22 = vld [vmem:[%s2689_s5 + $0x80] sm:$0xff]  ;;  %v1515_v23 = vld [vmem:[%s2689_s5 + $0x88] sm:$0xff] }
  0x37   :  { %1977 = vmatprep.subr.bf16.mxu0 %v1976_v28  ;;  %v2068_v27 = vpack.c.bf16 %v1515_v23, %v1514_v22  ;;  %v1518_v33 = vld [vmem:[%s2689_s5 + $0xa0] sm:$0xff]  ;;  %v1521_v38 = vld [vmem:[%s2689_s5 + $0xb8] sm:$0xff]  ;;  %v1524_v43 = vld [vmem:[%s2689_s5 + $0xd0] sm:$0xff] }
  0x38   :  { %v1525_v44 = vld [vmem:[%s2689_s5 + $0xd8] sm:$0xff]  ;;  %v1527_v47 = vld [vmem:[%s2689_s5 + $0xe8] sm:$0xff]  ;;  %v1513_v62 = vld [vmem:[%s2687_s3] ss:$0 sm:$0xff]  ;;  %s2266_s3 = smov 112  }
  0x39   :  { %1737 = vmatmul.mubr.msk.f32.vlgmr.msra.gmra.mrb[0].mxu1 %vm73_vm0, %v2386_v13  ;;  %v1542_v23 = vld [vmem:[%s2689_s5 + $0x140] sm:$0xff] }
  0x3a   :  { %1739 = vmatprep.mubr.msk.f32.mxu1 %vm73_vm0, %v2391_v14  ;;  %1979 = vmatpush3.bf16.msra.mxu0 %v1976_v28  ;;  %v1516_v28 = vld [vmem:[%s2689_s5 + $0x90] sm:$0xff] }
  0x3d   :  { %1740 = vmatmul.mubr.msk.f32.gmra.mrb[2].mxu1 %vm73_vm0, %v2400_v15  ;;  %1715 = vmatmul.mubr.msk.f32.vlgmr.msra.gmra.mrb[0].mxu0 %vm73_vm0, %v2386_v13 }
  0x3e   :  { %1750 = vmatprep.mubr.msk.f32.mxu1 %vm274_vm1, %v270_v25  ;;  %1717 = vmatprep.mubr.msk.f32.mxu0 %vm73_vm0, %v2391_v14 }
  0x41   :  { %1718 = vmatmul.mubr.msk.f32.gmra.mrb[2].mxu0 %vm73_vm0, %v2400_v15 }
  0x42   :  { %1764 = vmatprep.mubr.msk.f32.mxu0 %vm274_vm1, %v171_v56  ;;  %v699_v56 = vld [vmem:[%s2689_s5 + $0x78] sm:$0xff] }
 0x10c   :  { %v1738_v29 = vpop.f32.mrb[0].mxu1 }
 0x10d   :  { %v250_v30 = vpop.f32.mrb[1].mxu1 }
 0x10e   :  { %v1996_v31 = vpack.c.bf16 %v1738_v29, %v250_v30  ;;  %v1517_v29 = vld [vmem:[%s2689_s5 + $0x98] sm:$0xff]  ;;  %v565_v30 = vld [vmem:[#allocation2 + $0x48] sm:$0xff] }
 0x10f   :  { %v2072_v32 = vpack.c.bf16 %v1517_v29, %v1516_v28  ;;  %v1546_v29 = vld [vmem:[%s2689_s5 + $0x160] sm:$0xff] }
 0x110   :  { %v1741_v34 = vpop.f32.mrb[2].mxu1  ;;  %1997 = vmatprep.subr.bf16.mxu1 %v1996_v31  ;;  %v1716_v50 = vpop.f32.mrb[0].mxu0 }
 0x111   :  { %v260_v35 = vpop.f32.mrb[3].mxu1  ;;  %1999 = vmatpush3.bf16.msra.mxu1 %v1996_v31  ;;  %v152_v51 = vpop.f32.mrb[1].mxu0  ;;  %v566_v31 = vld [vmem:[#allocation2 + $0x50] sm:$0xff] }
 0x112   :  { %v2000_v36 = vpack.c.bf16 %v1741_v34, %v260_v35  ;;  %v2004_v52 = vpack.c.bf16 %v1716_v50, %v152_v51  ;;  %v1519_v34 = vld [vmem:[%s2689_s5 + $0xa8] sm:$0xff]  ;;  %v567_v35 = vld [vmem:[#allocation2 + $0x58] sm:$0xff] }
 0x113   :  { %v697_v50 = vld [vmem:[%s2689_s5 + $0x68] sm:$0xff] }
 0x114   :  { %2001 = vmatprep.subr.bf16.mxu1 %v2000_v36  ;;  %v1719_v53 = vpop.f32.mrb[2].mxu0  ;;  %2005 = vmatprep.subr.bf16.mxu0 %v2004_v52 }
 0x115   :  { %2003 = vmatpush3.bf16.msra.mxu1 %v2000_v36  ;;  %v162_v54 = vpop.f32.mrb[3].mxu0  ;;  %2007 = vmatpush3.bf16.msra.mxu0 %v2004_v52  ;;  %v2076_v36 = vpack.c.bf16 %v1519_v34, %v1518_v33  ;;  %v1528_v52 = vld [vmem:[%s2689_s5 + $0xf0] sm:$0xff]  ;;  %v1549_v33 = vld [vmem:[%s2689_s5 + $0x178] sm:$0xff] }
 0x116   :  { %2013 = vmatprep.subr.bf16.mxu1 %v2012_v37  ;;  %v2008_v55 = vpack.c.bf16 %v1719_v53, %v162_v54  ;;  %v1529_v53 = vld [vmem:[%s2689_s5 + $0xf8] sm:$0xff] }
 0x117   :  { %v2096_v54 = vpack.c.bf16 %v1529_v53, %v1528_v52 }
 0x118   :  { %1751 = vmatmul.mubr.msk.f32.vlgmr.msra.gmra.mrb[4].mxu1 %vm274_vm1, %v271_v40  ;;  %2009 = vmatprep.subr.bf16.mxu0 %v2008_v55  ;;  %v1522_v40 = vld [vmem:[%s2689_s5 + $0xc0] sm:$0xff] }
 0x119   :  { %2015 = vmatpush3.bf16.msra.mxu1 %v2012_v37  ;;  %1753 = vmatprep.mubr.msk.f32.mxu1 %vm274_vm1, %v272_v42  ;;  %v1520_v37 = vld [vmem:[%s2689_s5 + $0xb0] sm:$0xff] }
 0x11a   :  { %2017 = vmatprep.subr.bf16.mxu1 %v2016_v41  ;;  %2011 = vmatpush3.bf16.msra.mxu0 %v2008_v55  ;;  %v2080_v39 = vpack.c.bf16 %v1521_v38, %v1520_v37  ;;  %v698_v55 = vld [vmem:[%s2689_s5 + $0x70] sm:$0xff] }
 0x11c   :  { %1754 = vmatmul.mubr.msk.f32.gmra.mrb[6].mxu1 %vm274_vm1, %v273_v45  ;;  %v2088_v45 = vpack.c.bf16 %v1525_v44, %v1524_v43 }
 0x11d   :  { %2019 = vmatpush3.bf16.msra.mxu1 %v2016_v41  ;;  %1786 = vmatprep.mubr.msk.f32.mxu1 %vm73_vm0, %v2371_v8  ;;  %v2048_v8 = vpack.c.bf16 %v691_v7, %v690_v6  ;;  %v1523_v41 = vld [vmem:[%s2689_s5 + $0xc8] sm:$0xff]  ;;  %v1537_v6 = vld [vmem:[%s2689_s5 + $0x118] sm:$0xff] }
 0x11e   :  { %2021 = vmatprep.subr.bf16.mxu1 %v2020_v46  ;;  %1765 = vmatmul.mubr.msk.f32.vlgmr.msra.gmra.mrb[4].mxu0 %vm274_vm1, %v172_v57  ;;  %v2084_v42 = vpack.c.bf16 %v1523_v41, %v1522_v40  ;;  %v2064_v57 = vpack.c.bf16 %v699_v56, %v698_v55 }
 0x11f   :  { %1767 = vmatprep.mubr.msk.f32.mxu0 %vm274_vm1, %v173_v58  ;;  %v1534_v58 = vld [vmem:[%s2689_s5 + $0x100] sm:$0xff] }
 0x121   :  { %2023 = vmatpush3.bf16.msra.mxu1 %v2020_v46  ;;  %v1526_v46 = vld [vmem:[%s2689_s5 + $0xe0] sm:$0xff] }
 0x122   :  { %2025 = vmatprep.subr.bf16.mxu1 %v2024_v49  ;;  %1768 = vmatmul.mubr.msk.f32.gmra.mrb[6].mxu0 %vm274_vm1, %v174_v59  ;;  %v2092_v48 = vpack.c.bf16 %v1527_v47, %v1526_v46  ;;  %v1535_v59 = vld [vmem:[%s2689_s5 + $0x108] sm:$0xff] }
 0x123   :  { %1800 = vmatprep.mubr.msk.f32.mxu0 %vm274_vm1, %v564_v60  ;;  %v2116_v60 = vpack.c.bf16 %v1535_v59, %v1534_v58  ;;  %v1158_v58 = vld [vmem:[#allocation5 + $0x28] sm:$0xff]  ;;  %v1552_v59 = vld [vmem:[%s2690_s6] ss:$0 sm:$0xff]  ;;  %s2270_s6 = smov 32  }
 0x125   :  { %2027 = vmatpush3.bf16.msra.mxu1 %v2024_v49  ;;  %v696_v49 = vld [vmem:[%s2689_s5 + $0x60] sm:$0xff] }
 0x126   :  { %2037 = vmatprep.subr.bf16.mxu1 %v2036_v63  ;;  %v2060_v51 = vpack.c.bf16 %v697_v50, %v696_v49  ;;  %v785_v49 = vld [vmem:[#allocation5] sm:$0xff]  ;;  %v786_v50 = vld [vmem:[#allocation5 + $0x8] sm:$0xff] }
 0x128   :  { %1787 = vmatmul.mubr.msk.f32.vlgmr.msra.gmra.mrb[8].mxu1 %vm73_vm0, %v2386_v13  ;;  %v695_v13 = vld [vmem:[%s2689_s5 + $0x58] sm:$0xff] }
 0x129   :  { %1789 = vmatprep.mubr.msk.f32.mxu1 %vm73_vm0, %v2391_v14  ;;  %2039 = vmatpush3.bf16.msra.mxu1 %v2036_v63  ;;  %v2056_v14 = vpack.c.bf16 %v695_v13, %v694_v12 }
 0x12a   :  { %2041 = vmatprep.subr.bf16.mxu1 %v2040_v2 }
 0x12c   :  { %1790 = vmatmul.mubr.msk.f32.gmra.mrb[10].mxu1 %vm73_vm0, %v2400_v15 }
 0x12d   :  { %2043 = vmatpush3.bf16.msra.mxu1 %v2040_v2 }
 0x12e   :  { %2045 = vmatprep.subr.bf16.mxu1 %v2044_v5 }
 0x131   :  { %2047 = vmatpush3.bf16.msra.mxu1 %v2044_v5  ;;  %v1536_v5 = vld [vmem:[%s2689_s5 + $0x110] sm:$0xff] }
 0x132   :  { %2049 = vmatprep.subr.bf16.mxu1 %v2048_v8  ;;  %v2120_v13 = vpack.c.bf16 %v1537_v6, %v1536_v5 }
 0x135   :  { %2051 = vmatpush3.bf16.msra.mxu1 %v2048_v8 }
 0x136   :  { %2053 = vmatprep.subr.bf16.mxu1 %v2052_v11 }
 0x139   :  { %2055 = vmatpush3.bf16.msra.mxu1 %v2052_v11 }
 0x13a   :  { %2057 = vmatprep.subr.bf16.mxu1 %v2056_v14 }
 0x13d   :  { %2059 = vmatpush3.bf16.msra.mxu1 %v2056_v14 }
 0x13e   :  { %2061 = vmatprep.subr.bf16.mxu1 %v2060_v51 }
 0x141   :  { %2063 = vmatpush3.bf16.msra.mxu1 %v2060_v51  ;;  %v1157_v51 = vld [vmem:[#allocation5 + $0x20] sm:$0xff] }
 0x142   :  { %2065 = vmatprep.subr.bf16.mxu1 %v2064_v57 }
 0x145   :  { %2067 = vmatpush3.bf16.msra.mxu1 %v2064_v57 }
 0x1eb   :  { %v2511_v15 = vpop.f32.mrb[4].mxu1 }
 0x1ec   :  { %v2513_v16 = vpop.f32.mrb[5].mxu1 }
 0x1ef   :  { %v2515_v17 = vpop.f32.mrb[6].mxu1 }
 0x1f0   :  { %v2517_v18 = vpop.f32.mrb[7].mxu1 }
 0x1fb   :  { %v1788_v19 = vpop.f32.mrb[8].mxu1 }
 0x1fc   :  { %v544_v20 = vpop.f32.mrb[9].mxu1 }
 0x1fd   :  { %v2028_v21 = vpack.c.bf16 %v1788_v19, %v544_v20  ;;  %v1540_v20 = vld [vmem:[%s2689_s5 + $0x130] sm:$0xff] }
 0x1ff   :  { %v1791_v24 = vpop.f32.mrb[10].mxu1  ;;  %2029 = vmatprep.subr.bf16.mxu0 %v2028_v21 }
 0x200   :  { %v554_v25 = vpop.f32.mrb[11].mxu1  ;;  %2031 = vmatpush3.bf16.msra.mxu0 %v2028_v21  ;;  %v1541_v21 = vld [vmem:[%s2689_s5 + $0x138] sm:$0xff] }
 0x201   :  { %v2032_v26 = vpack.c.bf16 %v1791_v24, %v554_v25  ;;  %v2128_v22 = vpack.c.bf16 %v1541_v21, %v1540_v20  ;;  %v1543_v24 = vld [vmem:[%s2689_s5 + $0x148] sm:$0xff] }
 0x202   :  { %v2132_v25 = vpack.c.bf16 %v1543_v24, %v1542_v23 }
 0x203   :  { %2033 = vmatprep.subr.bf16.mxu0 %v2032_v26 }
 0x204   :  { %2035 = vmatpush3.bf16.msra.mxu0 %v2032_v26  ;;  %v1544_v26 = vld [vmem:[%s2689_s5 + $0x150] sm:$0xff] }
 0x205   :  { %2069 = vmatprep.subr.bf16.mxu0 %v2068_v27 }
 0x207   :  { %1801 = vmatmul.mubr.msk.f32.vlgmr.msra.gmra.mrb[4].mxu0 %vm274_vm1, %v565_v30  ;;  %v1547_v30 = vld [vmem:[%s2689_s5 + $0x168] sm:$0xff] }
 0x208   :  { %1803 = vmatprep.mubr.msk.f32.mxu0 %vm274_vm1, %v566_v31  ;;  %2071 = vmatpush3.bf16.msra.mxu0 %v2068_v27  ;;  %v1545_v27 = vld [vmem:[%s2689_s5 + $0x158] sm:$0xff]  ;;  %v2140_v31 = vpack.c.bf16 %v1547_v30, %v1546_v29 }
 0x209   :  { %2073 = vmatprep.subr.bf16.mxu0 %v2072_v32  ;;  %v2136_v28 = vpack.c.bf16 %v1545_v27, %v1544_v26 }
 0x20b   :  { %1804 = vmatmul.mubr.msk.f32.gmra.mrb[6].mxu0 %vm274_vm1, %v567_v35  ;;  %v890_v35 = vld [vmem:[#allocation5 + $0x10] sm:$0xff] }
 0x20c   :  { %2075 = vmatpush3.bf16.msra.mxu0 %v2072_v32  ;;  %v1548_v32 = vld [vmem:[%s2689_s5 + $0x170] sm:$0xff] }
 0x20d   :  { %2077 = vmatprep.subr.bf16.mxu0 %v2076_v36  ;;  %v2144_v34 = vpack.c.bf16 %v1549_v33, %v1548_v32 }
 0x210   :  { %2079 = vmatpush3.bf16.msra.mxu0 %v2076_v36 }
 0x211   :  { %2081 = vmatprep.subr.bf16.mxu0 %v2080_v39 }
 0x214   :  { %2083 = vmatpush3.bf16.msra.mxu0 %v2080_v39 }
 0x215   :  { %2085 = vmatprep.subr.bf16.mxu0 %v2084_v42 }
 0x218   :  { %2087 = vmatpush3.bf16.msra.mxu0 %v2084_v42 }
 0x219   :  { %2089 = vmatprep.subr.bf16.mxu0 %v2088_v45 }
 0x21c   :  { %2091 = vmatpush3.bf16.msra.mxu0 %v2088_v45 }
 0x21d   :  { %2093 = vmatprep.subr.bf16.mxu0 %v2092_v48 }
 0x220   :  { %2095 = vmatpush3.bf16.msra.mxu0 %v2092_v48  ;;  %v891_v48 = vld [vmem:[#allocation5 + $0x18] sm:$0xff] }
 0x221   :  { %2097 = vmatprep.subr.bf16.mxu0 %v2096_v54 }
 0x224   :  { %2099 = vmatpush3.bf16.msra.mxu0 %v2096_v54 }
 0x225   :  { %2117 = vmatprep.subr.bf16.mxu0 %v2116_v60 }
 0x2da   :  { %v1802_v61 = vpop.f32.mrb[4].mxu0 }
 0x2db   :  { %v2162_v63 = vadd.f32 %v1802_v61, %v2511_v15  ;;  %v646_v0 = vpop.f32.mrb[5].mxu0  ;;  %v1538_v15 = vld [vmem:[%s2689_s5 + $0x120] sm:$0xff] }
 0x2dc   :  { %v2163_v1 = vadd.f32 %v646_v0, %v2513_v16  ;;  %v1539_v16 = vld [vmem:[%s2689_s5 + $0x128] sm:$0xff] }
 0x2dd   :  { %v677_v2 = vadd.f32 %v2162_v63, %v1513_v62 }
 0x2de   :  { %v676_v3 = vadd.f32 %v2163_v1, %v1513_v62  ;;  %v1805_v4 = vpop.f32.mrb[6].mxu0 }
 0x2df   :  { %v2164_v7 = vadd.f32 %v1805_v4, %v2515_v17  ;;  %v656_v8 = vpop.f32.mrb[7].mxu0  ;;  %v681_v11 = vmax.f32 %v677_v2, 0.0  ;;  %v1371_v2 = vld [vmem:[%s2691_s7] sm:$0xff]  ;;  %v2272_v4 = vmov 0.0|0.0  }
 0x2e0   :  { %v680_v9 = vmax.f32 %v676_v3, 0.0  ;;  %v2165_v10 = vadd.f32 %v656_v8, %v2517_v18  ;;  %v2124_v18 = vpack.c.bf16 %v1539_v16, %v1538_v15  ;;  %v1372_v3 = vld [vmem:[%s2691_s7 + $0x8] sm:$0xff] }
 0x2e1   :  { %v679_v12 = vadd.f32 %v2164_v7, %v1513_v62  ;;  %v2157_v5 = vpack.c.bf16 %v1372_v3, %v1371_v2 }
 0x2e2   :  { %v678_v14 = vadd.f32 %v2165_v10, %v1513_v62  ;;  %1838 = vmatprep.mubr.f32.mxu1 %v680_v9  ;;  %1876 = vmatprep.mubr.f32.mxu0 %v680_v9 }
 0x2e3   :  { %1839 = vmatmul.mubr.f32.vlgmr.msra.gmra.mrb[12].mxu1 %v681_v11  ;;  %1877 = vmatmul.mubr.f32.vlgmr.msra.gmra.mrb[8].mxu0 %v681_v11  ;;  %v683_v19 = vmax.f32 %v679_v12, 0.0 }
 0x2e4   :  { %v682_v17 = vmax.f32 %v678_v14, 0.0  ;;  %2119 = vmatpush3.bf16.msra.mxu0 %v2116_v60 }
 0x2e5   :  { %2121 = vmatprep.subr.bf16.mxu0 %v2120_v13 }
 0x2e6   :  { %1841 = vmatprep.mubr.f32.mxu1 %v682_v17  ;;  %1879 = vmatprep.mubr.f32.mxu0 %v682_v17 }
 0x2e7   :  { %1842 = vmatmul.mubr.f32.gmra.mrb[14].mxu1 %v683_v19  ;;  %1880 = vmatmul.mubr.f32.gmra.mrb[10].mxu0 %v683_v19 }
 0x2e8   :  { %2123 = vmatpush3.bf16.msra.mxu0 %v2120_v13  ;;  %1936 = vmatprep.mubr.f32.mxu0 %v680_v9 }
 0x2e9   :  { %2125 = vmatprep.subr.bf16.mxu0 %v2124_v18  ;;  %1890 = vmatprep.mubr.msk.f32.mxu1 %vm274_vm1, %v890_v35 }
 0x2ec   :  { %2127 = vmatpush3.bf16.msra.mxu0 %v2124_v18 }
 0x2ed   :  { %2129 = vmatprep.subr.bf16.mxu0 %v2128_v22 }
 0x2f0   :  { %2131 = vmatpush3.bf16.msra.mxu0 %v2128_v22 }
 0x2f1   :  { %2133 = vmatprep.subr.bf16.mxu0 %v2132_v25 }
 0x2f4   :  { %2135 = vmatpush3.bf16.msra.mxu0 %v2132_v25 }
 0x2f5   :  { %2137 = vmatprep.subr.bf16.mxu0 %v2136_v28 }
 0x2f8   :  { %2139 = vmatpush3.bf16.msra.mxu0 %v2136_v28 }
 0x2f9   :  { %2141 = vmatprep.subr.bf16.mxu0 %v2140_v31 }
 0x2fc   :  { %2143 = vmatpush3.bf16.msra.mxu0 %v2140_v31 }
 0x2fd   :  { %2145 = vmatprep.subr.bf16.mxu0 %v2144_v34 }
 0x300   :  { %2147 = vmatpush3.bf16.msra.mxu0 %v2144_v34 }
 0x303   :  { %1937 = vmatmul.mubr.f32.vlgmr.msra.gmra.mrb[12].mxu0 %v681_v11 }
 0x304   :  { %1939 = vmatprep.mubr.f32.mxu0 %v682_v17 }
 0x307   :  { %1940 = vmatmul.mubr.f32.gmra.mrb[14].mxu0 %v683_v19 }
 0x3b6   :  { %v1840_v36 = vpop.f32.mrb[12].mxu1  ;;  %v1878_v37 = vpop.f32.mrb[8].mxu0 }
 0x3b7   :  { %v766_v38 = vpop.f32.mrb[13].mxu1  ;;  %v870_v39 = vpop.f32.mrb[9].mxu0 }
 0x3b8   :  { %v2108_v40 = vpack.c.bf16 %v1840_v36, %v766_v38  ;;  %v2100_v41 = vpack.c.bf16 %v1878_v37, %v870_v39 }
 0x3ba   :  { %v1843_v42 = vpop.f32.mrb[14].mxu1  ;;  %v1881_v43 = vpop.f32.mrb[10].mxu0  ;;  %2101 = vmatprep.subr.bf16.mxu1 %v2100_v41 }
 0x3bb   :  { %v776_v44 = vpop.f32.mrb[15].mxu1  ;;  %v880_v45 = vpop.f32.mrb[11].mxu0  ;;  %2103 = vmatpush3.bf16.msra.mxu1 %v2100_v41 }
 0x3bc   :  { %v2112_v46 = vpack.c.bf16 %v1843_v42, %v776_v44  ;;  %v2104_v47 = vpack.c.bf16 %v1881_v43, %v880_v45 }
 0x3be   :  { %2105 = vmatprep.subr.bf16.mxu1 %v2104_v47 }
 0x3bf   :  { %2107 = vmatpush3.bf16.msra.mxu1 %v2104_v47 }
 0x3c0   :  { %2109 = vmatprep.subr.bf16.mxu1 %v2108_v40 }
 0x3c2   :  { %1891 = vmatmul.mubr.msk.f32.vlgmr.msra.gmra.mrb[16].mxu1 %vm274_vm1, %v891_v48  ;;  %v1373_v48 = vld [vmem:[%s2691_s7 + $0x10] sm:$0xff] }
 0x3c3   :  { %2111 = vmatpush3.bf16.msra.mxu1 %v2108_v40  ;;  %1901 = vmatprep.mubr.msk.f32.mxu1 %vm274_vm1, %v785_v49  ;;  %v1374_v49 = vld [vmem:[%s2691_s7 + $0x18] sm:$0xff] }
 0x3c4   :  { %2113 = vmatprep.subr.bf16.mxu1 %v2112_v46 }
 0x3c7   :  { %2115 = vmatpush3.bf16.msra.mxu1 %v2112_v46 }
 0x3ca   :  { %1902 = vmatmul.mubr.msk.f32.vlgmr.msra.gmra.mrb[16].mxu1 %vm274_vm1, %v786_v50 }
 0x3cb   :  { %1950 = vmatprep.mubr.msk.f32.mxu1 %vm274_vm1, %v1157_v51 }
 0x3d6   :  { %v1938_v52 = vpop.f32.mrb[12].mxu0 }
 0x3d7   :  { %v1137_v53 = vpop.f32.mrb[13].mxu0 }
 0x3d8   :  { %v2148_v54 = vpack.c.bf16 %v1938_v52, %v1137_v53  ;;  %v2160_v52 = vpack.c.bf16 %v1374_v49, %v1373_v48 }
 0x3da   :  { %v1941_v55 = vpop.f32.mrb[14].mxu0  ;;  %2149 = vmatprep.subr.bf16.mxu1 %v2148_v54 }
 0x3db   :  { %v1147_v56 = vpop.f32.mrb[15].mxu0  ;;  %2151 = vmatpush3.bf16.msra.mxu1 %v2148_v54 }
 0x3dc   :  { %v2152_v57 = vpack.c.bf16 %v1941_v55, %v1147_v56 }
 0x3de   :  { %2153 = vmatprep.subr.bf16.mxu1 %v2152_v57 }
 0x3df   :  { %2155 = vmatpush3.bf16.msra.mxu1 %v2152_v57  ;;  %v2274_v57 = vmov 0.0  }
 0x3e0   :  { %2156 = vmatprep.subr.bf16.mxu1 %v2272_v4 }
 0x3e2   :  { %1951 = vmatmul.mubr.msk.f32.vlgmr.msra.gmra.mrb[16].mxu1 %vm274_vm1, %v1158_v58 }
 0x3e3   :  { %2158 = vmatpush3.bf16.msra.mxu1 %v2157_v5  ;;  %1961 = vmatprep.mubr.msk.f32.mxu1 %vm2273_vm3, %v2274_v57 }
 0x3e4   :  { %2159 = vmatprep.subr.bf16.mxu1 %v2272_v4 }
 0x3e7   :  { %2161 = vmatpush3.bf16.msra.mxu1 %v2160_v52 }
 0x4b5   :  { %v1952_v60 = vpop.f32.mrb[16].mxu1 }
 0x4b6   :  { %v1250_v61 = vadd.f32 %v1952_v60, %v1552_v59  ;;  %v1231_v62 = vpop.f32.mrb[17].mxu1 }
 0x4b7   :  { %v1249_v0 = vadd.f32 %v1552_v59, %v1231_v62 }
 0x4b8   :  { %v1252_v63 = vmax.f32 %v1250_v61, 0.0 }
 0x4b9   :  { %v1251_v1 = vmax.f32 %v1249_v0, 0.0 }
 0x4ba   :  { %1267 = vrot.lane.b32.xlu1 %v1252_v63, %s2265_s0  ;;  %1257 = vrot.lane.b32.xlu0 %v1252_v63, %s2266_s3 }
 0x4be   :  { %1277 = vrot.lane.b32.xlu0 %v1252_v63, %s2267_s4  ;;  %1265 = vrot.lane.b32.xlu1 %v1251_v1, %s2265_s0 }
 0x4c2   :  { %1287 = vrot.lane.b32.xlu0 %v1252_v63, %s2268_s2  ;;  %1275 = vrot.lane.b32.xlu1 %v1251_v1, %s2267_s4 }
 0x4c6   :  { %1285 = vrot.lane.b32.xlu1 %v1251_v1, %s2268_s2  ;;  %1255 = vrot.lane.b32.xlu0 %v1251_v1, %s2266_s3 }
 0x4ca   :  { %1295 = vrot.lane.b32.xlu1 %v1251_v1, %s2269_s19  ;;  %1297 = vrot.lane.b32.xlu0 %v1252_v63, %s2269_s19 }
 0x4ce   :  { %1305 = vrot.lane.b32.xlu1 %v1251_v1, %s2270_s6  ;;  %1307 = vrot.lane.b32.xlu0 %v1252_v63, %s2270_s6 }
 0x4d2   :  { %1315 = vrot.lane.b32.xlu1 %v1251_v1, %s2271_s20  ;;  %1317 = vrot.lane.b32.xlu0 %v1252_v63, %s2271_s20 }
 0x52c   :  { %v1268_v6 = vpop.permute.xlu1 %1267  ;;  %v1258_v7 = vpop.permute.xlu0 %1257 }
 0x52d   :  { %v1262_v8 = vmax.f32 %v1252_v63, %v1258_v7  ;;  %v1264_v15 = vadd.f32 %v1258_v7, %v1252_v63 }
 0x52f   :  { %v1272_v9 = vmax.f32 %v1262_v8, %v1268_v6  ;;  %v1274_v18 = vadd.f32 %v1268_v6, %v1264_v15 }
 0x530   :  { %v1278_v10 = vpop.permute.xlu0 %1277  ;;  %v1266_v11 = vpop.permute.xlu1 %1265 }
 0x531   :  { %v1282_v12 = vmax.f32 %v1272_v9, %v1278_v10  ;;  %v1284_v26 = vadd.f32 %v1278_v10, %v1274_v18 }
 0x534   :  { %v1288_v13 = vpop.permute.xlu0 %1287  ;;  %v1276_v14 = vpop.permute.xlu1 %1275 }
 0x535   :  { %v1292_v16 = vmax.f32 %v1282_v12, %v1288_v13  ;;  %v1294_v30 = vadd.f32 %v1288_v13, %v1284_v26 }
 0x538   :  { %v1286_v17 = vpop.permute.xlu1 %1285  ;;  %v1256_v19 = vpop.permute.xlu0 %1255 }
 0x539   :  { %v1261_v20 = vmax.f32 %v1251_v1, %v1256_v19  ;;  %v1263_v21 = vadd.f32 %v1256_v19, %v1251_v1 }
 0x53b   :  { %v1271_v22 = vmax.f32 %v1261_v20, %v1266_v11  ;;  %v1273_v23 = vadd.f32 %v1266_v11, %v1263_v21 }
 0x53c   :  { %v1296_v24 = vpop.permute.xlu1 %1295  ;;  %v1298_v25 = vpop.permute.xlu0 %1297 }
 0x53d   :  { %v1281_v27 = vmax.f32 %v1271_v22, %v1276_v14  ;;  %v1283_v28 = vadd.f32 %v1276_v14, %v1273_v23  ;;  %v1302_v29 = vmax.f32 %v1292_v16, %v1298_v25  ;;  %v1304_v37 = vadd.f32 %v1298_v25, %v1294_v30 }
 0x53f   :  { %v1291_v31 = vmax.f32 %v1281_v27, %v1286_v17  ;;  %v1293_v32 = vadd.f32 %v1286_v17, %v1283_v28 }
 0x540   :  { %v1306_v33 = vpop.permute.xlu1 %1305  ;;  %v1308_v34 = vpop.permute.xlu0 %1307 }
 0x541   :  { %v1301_v35 = vmax.f32 %v1291_v31, %v1296_v24  ;;  %v1303_v36 = vadd.f32 %v1296_v24, %v1293_v32  ;;  %v1312_v38 = vmax.f32 %v1302_v29, %v1308_v34  ;;  %v1314_v41 = vadd.f32 %v1308_v34, %v1304_v37  ;;  %v1553_v24 = vld [vmem:[%s2692_s8] ss:$0 sm:$0xff] }
 0x543   :  { %v1311_v39 = vmax.f32 %v1301_v35, %v1306_v33  ;;  %v1313_v40 = vadd.f32 %v1306_v33, %v1303_v36 }
 0x544   :  { %v1316_v42 = vpop.permute.xlu1 %1315  ;;  %v1318_v43 = vpop.permute.xlu0 %1317 }
 0x545   :  { %v1323_v44 = vadd.f32 %v1316_v42, %v1313_v40  ;;  %v1324_v45 = vadd.f32 %v1318_v43, %v1314_v41  ;;  %v1322_v2 = vmax.f32 %v1312_v38, %v1318_v43  ;;  %v1321_v3 = vmax.f32 %v1311_v39, %v1316_v42 }
 0x547   :  { %v1333_v46 = vsel %vm1325_vm2, %v1323_v44, 0.0  ;;  %v1353_v47 = vsel %vm1325_vm2, %v1324_v45, 0.0  ;;  %v1346_v4 = vsel %vm1325_vm2, %v1322_v2, -inf  ;;  %v1326_v5 = vsel %vm1325_vm2, %v1321_v3, -inf }
 0x548   :  { %v1334_v50 = vrot.slane %v1333_v46, 4  ;;  %v1354_v51 = vrot.slane %v1353_v47, 4  ;;  %v1347_v6 = vrot.slane %v1346_v4, 4  ;;  %v1327_v7 = vrot.slane %v1326_v5, 4 }
 0x54a   :  { %v1335_v53 = vadd.f32 %v1334_v50, %v1333_v46  ;;  %v1355_v54 = vadd.f32 %v1354_v51, %v1353_v47  ;;  %v1348_v8 = vmax.f32 %v1346_v4, %v1347_v6  ;;  %v1328_v9 = vmax.f32 %v1326_v5, %v1327_v7 }
 0x54c   :  { %v1336_v55 = vrot.slane %v1335_v53, 2  ;;  %v1356_v56 = vrot.slane %v1355_v54, 2  ;;  %v1349_v10 = vrot.slane %v1348_v8, 2  ;;  %v1329_v11 = vrot.slane %v1328_v9, 2 }
 0x54e   :  { %v1337_v58 = vadd.f32 %v1336_v55, %v1335_v53  ;;  %v1357_v59 = vadd.f32 %v1356_v56, %v1355_v54  ;;  %v1350_v12 = vmax.f32 %v1348_v8, %v1349_v10  ;;  %v1330_v13 = vmax.f32 %v1328_v9, %v1329_v11 }
 0x550   :  { %v1338_v60 = vrot.slane %v1337_v58, 1  ;;  %v1358_v61 = vrot.slane %v1357_v59, 1  ;;  %v1351_v14 = vrot.slane %v1350_v12, 1  ;;  %v1331_v15 = vrot.slane %v1330_v13, 1 }
 0x552   :  { %v1339_v62 = vadd.f32 %v1338_v60, %v1337_v58  ;;  %v1359_v63 = vadd.f32 %v1358_v61, %v1357_v59  ;;  %v1352_v16 = vmax.f32 %v1350_v12, %v1351_v14  ;;  %v1332_v18 = vmax.f32 %v1330_v13, %v1331_v15 }
 0x554   :  { %v1340_v0 = vmul.f32 0.015625, %v1339_v62  ;;  %v1360_v1 = vmul.f32 0.015625, %v1359_v63 }
 0x556   :  { %1342 = vrot.lane.b32.xlu1 %v1340_v0, %s2271_s20  ;;  %1362 = vrot.lane.b32.xlu0 %v1360_v1, %s2271_s20 }
 0x5c8   :  { %v1343_v17 = vpop.permute.xlu1 %1342  ;;  %v1363_v19 = vpop.permute.xlu0 %1362 }
 0x5c9   :  { %v1365_v20 = vsel %vm1325_vm2, %v1352_v16, %v1363_v19  ;;  %v1345_v22 = vsel %vm1325_vm2, %v1332_v18, %v1343_v17 }
 0x5ca   :  { %v1367_v21 = vrot.slane %v1365_v20, 7 }
 0x5cc   :  { %v1370_v23 = vsel %vm1369_vm4, %v1345_v22, %v1367_v21 }
 0x5cd   :  { %1962 = vmatmul.mubr.msk.f32.vlgmr.msra.gmra.mrb[18].mxu1 %vm274_vm1, %v1370_v23 }
 0x6a0   :  { %v1451_v25 = vpop.f32.mrb[18].mxu1 }
 0x6a1   :  { %v1452_v26 = vadd.f32 %v1553_v24, %v1451_v25  ;;  %v1963_v27 = vpop.f32.mrb[19].mxu1 }
 0x6a3   :  { %1456 = vst.msk [vmem:[#allocation7] sm:$0x3] %vm1455_vm5, %v1452_v26 }
 0x6a4   :  { %2244 = shalt.err (!%p2241_p6)
}
 0x6a5   :  { %s2245_s14 = scalar_lea.hbm %s2693_s9, 32 }
 0x6a6   :  { %p2246_p7 = scmp.ne.s32.totalorder %s2693_s9, %s2245_s14  ;;  %p2249_p8 = scmp.lt.u32.totalorder %s2245_s14, %s2693_s9 }
 0x6a8   :  { %p2251_p9 = pnand %p2249_p8, %p2246_p7 }
 0x6aa   :  { %2254 = shalt.err (!%p2251_p9)
}
 0x6ab   :  { %1466 = dma.vmem_to_hbm [thread:$0]  %s1464_s12, 32, %s2693_s9, [#allocation4]  }
 0x6ac   :  { %2259 = dma.done.wait [#allocation4], 32  }
 0x6ad   :  { %2260 = vsyncadd [#allocation4], 4294967264 }
 0x6ae   :  { %1470 = vsyncpa [#allocation3], 1 }
 0x6af   :  { %1471 = vsyncpa [#allocation6], 1 }
 0x6b0   :  { %1472 = vsyncpa [#allocation4], 1 }

</bundles_post_ra>
